<compile_context>
chip_gen: v5e
topology: v5e:2x2
jax: 0.10.0
libtpu: 0.0.40
codegen_flags: <defaults>
</compile_context>

<pallas_src>
import math

import jax
import jax.numpy as jnp
from jax.experimental import pallas as pl
from jax.experimental.pallas import tpu as pltpu

_HIDDEN = 1024  # fixed by the module: nn.Linear(input_dim, 1024)


def _round_up(x, m):
    return ((x + m - 1) // m) * m


def _cdiv(a, b):
    return -(-a // b)


def _vmem_capacity_bytes():
    """Physical VMEM of the attached TPU (fallback: v7x's 64 MiB)."""
    try:
        cap = int(getattr(pltpu.get_tpu_info(), "vmem_capacity_bytes", 0))
        if cap > 0:
            return cap
    except Exception:
        pass
    return 64 * 1024 * 1024


def _min_parallel_tiles():
    """2 on chips with two TensorCores behind one device (v4/v5p megacore, v7x)."""
    try:
        kind = jax.devices()[0].device_kind.lower()
    except Exception:
        return 1
    return 2 if any(tag in kind for tag in ("v4", "v5p", "7")) else 1


_CHUNKS = (4096, 3072, 2048, 1536, 1024, 768, 512, 384, 256, 128)


def _plan_tiles(M, K, n_pad, c_item, out_item, budget, min_i_tiles):
    """Jointly pick (tm, tk, padded_K).

    Preference order: keep the MXU M-dim large (>=128) and shrink tk first,
    prefer whole-K residency for w1 (loaded from HBM once instead of once per
    M tile), then the largest K chunk fitting the VMEM budget.
    """
    HID = _HIDDEN
    sub = {4: 8, 2: 16, 1: 32}.get(c_item, 8)   # sublane packing for compute dtype

    def usage(tm, tk, k_steps):
        w1_buf = 1 if k_steps == 1 else 2        # Buffered(1) when grid-invariant
        return (HID * n_pad * c_item + (HID + n_pad) * 4   # resident w2 + biases
                + w1_buf * tk * HID * c_item               # w1 tile(s)
                + 2 * tm * tk * c_item                     # x tile (double-buffered)
                + 2 * tm * n_pad * out_item                # out tile (double-buffered)
                + tm * HID * 4                             # f32 accumulator scratch
                + tm * HID * c_item                        # epilogue: h cast
                + 2 * tm * n_pad * 4)                      # epilogue: logits + exp (f32)

    tm_cap = min(512, _round_up(max(M, 1), sub))
    if min_i_tiles > 1 and M > sub:
        # Give every TensorCore at least one tile of the "parallel" M axis.
        tm_cap = max(sub, min(tm_cap, _round_up(_cdiv(M, min_i_tiles), sub)))

    cand = [t for t in (512, 384, 256, 128, 64, 32, 16, 8) if t % sub == 0]
    tm_all = [tm_cap] + [t for t in cand if t < tm_cap]
    floor = min(128, tm_cap)
    tm_big = [t for t in tm_all if t >= floor]
    tm_small = [t for t in tm_all if t < floor]

    # (tk, padded K) options: whole-K residency first, then divisor chunks,
    # then chunks that need K zero-padding (ragged input_dim).
    k_opts = [(K, K)]
    k_opts += [(c, K) for c in _CHUNKS if c < K and K % c == 0]
    k_opts += [(c, _round_up(K, c)) for c in _CHUNKS if c < K and K % c != 0]

    for tms in (tm_big, tm_small):
        for tm in tms:
            for tk, k_pad in k_opts:
                if usage(tm, tk, k_pad // tk) <= budget:
                    return tm, tk, k_pad

    # Last resort (e.g. output_dim so large that resident w2 alone busts the
    # budget): smallest tiles; correct but slow.
    # TODO(synk): tile the output_dim axis for extremely large output_dim.
    if K <= 128:
        return sub, K, K
    return sub, 128, _round_up(K, 128)


def _fgb3_kernel(x_ref, w1_ref, b1_ref, w2_ref, b2_ref, o_ref, acc_ref):
    """Fused (Linear + folded BN) -> Linear -> row softmax, K-chunked."""
    k = pl.program_id(1)

    @pl.when(k == 0)
    def _():
        # Seed the accumulator with the folded bias (saves a VPU add pass later).
        acc_ref[...] = jnp.broadcast_to(b1_ref[...], acc_ref.shape)

    acc_ref[...] += jnp.dot(x_ref[...], w1_ref[...],
                            preferred_element_type=jnp.float32)

    @pl.when(k == pl.num_programs(1) - 1)
    def _():
        h = acc_ref[...]                                           # (tm, 1024) f32
        logits = jnp.dot(h.astype(w2_ref.dtype), w2_ref[...],
                         preferred_element_type=jnp.float32) + b2_ref[...]
        m = jnp.max(logits, axis=-1, keepdims=True)
        e = jnp.exp(logits - m)
        inv = pl.reciprocal(jnp.sum(e, axis=-1, keepdims=True), approx=False)
        o_ref[...] = (e * inv).astype(o_ref.dtype)


def _invariant_spec(block_shape, index_map):
    """Grid-invariant block: single-buffered (halves its VMEM footprint)."""
    try:
        return pl.BlockSpec(block_shape, index_map, pipeline_mode=pl.Buffered(1))
    except (AttributeError, TypeError):   # older jax: fall back to default buffering
        return pl.BlockSpec(block_shape, index_map)


def feature_generation_block_3(x, params, *, eps=1e-5, compute_dtype=None):
    """Forward pass (inference-mode BatchNorm folded into the first Linear).

    x: [N, input_dim]
    params: w1 (input_dim, 1024), b1 (1024,), gamma/beta/running_mean/running_var
            (1024,), w2 (1024, output_dim), b2 (output_dim,).
    compute_dtype=jnp.bfloat16 is the fast path (2-4x MXU rate, half HBM bytes;
    accumulation stays f32).  Default keeps x.dtype for bit-accurate f32.
    """
    w1, b1 = params["w1"], params["b1"]
    w2, b2 = params["w2"], params["b2"]
    gamma, beta = params["gamma"], params["beta"]
    mean, var = params["running_mean"], params["running_var"]

    input_dim, hidden = w1.shape
    hidden2, output_dim = w2.shape
    assert hidden == _HIDDEN and hidden2 == _HIDDEN
    assert x.ndim == 2 and x.shape[-1] == input_dim

    out_dtype = x.dtype
    if compute_dtype is None:
        compute_dtype = x.dtype

    # Fold eval-mode BatchNorm:  bn(h) = h * scale + shift
    scale = gamma.astype(jnp.float32) * jax.lax.rsqrt(var.astype(jnp.float32) + eps)
    shift = beta.astype(jnp.float32) - mean.astype(jnp.float32) * scale
    w1_eff = (w1.astype(jnp.float32) * scale[None, :]).astype(compute_dtype)
    b1_eff = (b1.astype(jnp.float32) * scale + shift).reshape(1, _HIDDEN)   # f32
    w2_c = w2.astype(compute_dtype)
    b2_r = b2.astype(jnp.float32).reshape(1, output_dim)                    # f32
    x_c = x.astype(compute_dtype)

    M = x.shape[0]
    c_item = jnp.dtype(compute_dtype).itemsize
    o_item = jnp.dtype(out_dtype).itemsize

    # Lane-dense output: pad the 2nd-linear feature axis to a multiple of 128.
    # Padded columns get bias -1e30 so their softmax weight underflows to 0.
    n_pad = output_dim if output_dim % 128 == 0 else _round_up(output_dim, 128)
    if n_pad != output_dim:
        w2_c = jnp.pad(w2_c, ((0, 0), (0, n_pad - output_dim)))
        b2_r = jnp.pad(b2_r, ((0, 0), (0, n_pad - output_dim)),
                       constant_values=-1e30)

    vmem_cap = _vmem_capacity_bytes()              # 128 MiB v5e/v6e, 64 MiB v7x
    budget = vmem_cap // 2
    vmem_limit = max(32 * 1024 * 1024,
                     min(int(vmem_cap * 3 // 4), 112 * 1024 * 1024))
    min_i_tiles = _min_parallel_tiles()

    tm, tk, k_pad = _plan_tiles(M, input_dim, n_pad, c_item, o_item,
                                budget, min_i_tiles)

    if k_pad != input_dim:
        # Ragged input_dim: zero-pad K on both operands (contributes exactly 0).
        x_c = jnp.pad(x_c, ((0, 0), (0, k_pad - input_dim)))
        w1_eff = jnp.pad(w1_eff, ((0, k_pad - input_dim), (0, 0)))

    k_steps = k_pad // tk
    grid = (_cdiv(M, tm), k_steps)                 # no host-side pad of the M axis

    w1_spec = (_invariant_spec((tk, _HIDDEN), lambda i, k: (0, 0))
               if k_steps == 1
               else pl.BlockSpec((tk, _HIDDEN), lambda i, k: (k, 0)))

    cost = pl.CostEstimate(
        flops=2 * M * input_dim * _HIDDEN + 2 * M * _HIDDEN * n_pad,
        transcendentals=M * n_pad,
        bytes_accessed=(M * k_pad + k_pad * _HIDDEN + _HIDDEN * n_pad) * c_item
                       + (_HIDDEN + n_pad) * 4 + M * n_pad * o_item,
    )

    out = pl.pallas_call(
        _fgb3_kernel,
        out_shape=jax.ShapeDtypeStruct((M, n_pad), out_dtype),
        grid_spec=pltpu.PrefetchScalarGridSpec(
            num_scalar_prefetch=0,
            grid=grid,
            in_specs=[
                pl.BlockSpec((tm, tk), lambda i, k: (i, k)),             # x tile
                w1_spec,                                                 # w1 (BN folded)
                _invariant_spec((1, _HIDDEN), lambda i, k: (0, 0)),      # b1 (folded, f32)
                _invariant_spec((_HIDDEN, n_pad), lambda i, k: (0, 0)),  # w2 (resident)
                _invariant_spec((1, n_pad), lambda i, k: (0, 0)),        # b2 (f32)
            ],
            out_specs=pl.BlockSpec((tm, n_pad), lambda i, k: (i, 0)),
            scratch_shapes=[pltpu.VMEM((tm, _HIDDEN), jnp.float32)],
        ),
        compiler_params=pltpu.CompilerParams(
            dimension_semantics=("parallel", "arbitrary"),
            vmem_limit_bytes=vmem_limit,
        ),
        cost_estimate=cost,
    )(x_c, w1_eff, b1_eff, w2_c, b2_r)

    return out if n_pad == output_dim else out[:, :output_dim]


if __name__ == "__main__":
    key = jax.random.PRNGKey(0)

    def make_params(key, input_dim, output_dim):
        ks = jax.random.split(key, 9)
        w1 = jax.random.normal(ks[0], (input_dim, _HIDDEN), jnp.float32) / math.sqrt(input_dim)
        b1 = 0.1 * jax.random.normal(ks[1], (_HIDDEN,), jnp.float32)
        w2 = jax.random.normal(ks[2], (_HIDDEN, output_dim), jnp.float32) / math.sqrt(_HIDDEN)
        b2 = 0.1 * jax.random.normal(ks[3], (output_dim,), jnp.float32)
        gamma = 1.0 + 0.1 * jax.random.normal(ks[4], (_HIDDEN,), jnp.float32)
        beta = 0.1 * jax.random.normal(ks[5], (_HIDDEN,), jnp.float32)
        running_mean = 0.1 * jax.random.normal(ks[6], (_HIDDEN,), jnp.float32)
        running_var = jnp.abs(1.0 + 0.1 * jax.random.normal(ks[7], (_HIDDEN,), jnp.float32))
        p = dict(w1=w1, b1=b1, w2=w2, b2=b2, gamma=gamma, beta=beta,
                 running_mean=running_mean, running_var=running_var)
        return p, ks[8]

    def reference(x, p, eps=1e-5):
        h = x @ p["w1"] + p["b1"]
        h = (h - p["running_mean"]) / jnp.sqrt(p["running_var"] + eps) * p["gamma"] + p["beta"]
        logits = h @ p["w2"] + p["b2"]
        return jax.nn.softmax(logits, axis=1)

    # --- Test 1: f32 path, output_dim a multiple of 128 (no lane padding) ---
    batch, input_dim, output_dim = 16, 32, 128
    params, key = make_params(key, input_dim, output_dim)
    x = jax.random.normal(jax.random.fold_in(key, 0), (batch, input_dim), jnp.float32)
    out = feature_generation_block_3(x, params)
    jax.block_until_ready(out)
    ref = reference(x, params)
    assert out.shape == (batch, output_dim)
    assert bool(jnp.all(jnp.isfinite(out)))
    assert jnp.allclose(jnp.sum(out, axis=1), 1.0, atol=1e-5)
    assert jnp.allclose(out, ref, atol=1e-5, rtol=1e-4), float(jnp.max(jnp.abs(out - ref)))

    # --- Test 2: bf16 fast path + ragged output_dim (exercises lane-pad path) ---
    batch2, input_dim2, output_dim2 = 16, 32, 96
    params2, key = make_params(key, input_dim2, output_dim2)
    x2 = jax.random.normal(jax.random.fold_in(key, 1), (batch2, input_dim2), jnp.float32)
    out2 = feature_generation_block_3(x2, params2, compute_dtype=jnp.bfloat16)
    jax.block_until_ready(out2)
    ref2 = reference(x2, params2)
    assert out2.shape == (batch2, output_dim2)
    assert bool(jnp.all(jnp.isfinite(out2)))
    assert jnp.allclose(jnp.sum(out2, axis=1), 1.0, atol=1e-3)
    assert jnp.allclose(out2, ref2, atol=5e-2), float(jnp.max(jnp.abs(out2 - ref2)))

    print("KERNEL_OK")
</pallas_src>

<mosaic_0001>
module attributes {stable_mosaic.version = 11 : i64} {
  func.func @_fgb3_kernel(%arg0: i32, %arg1: i32, %arg2: memref<16x32xf32, #tpu.memory_space<vmem>>, %arg3: memref<32x1024xf32, #tpu.memory_space<vmem>>, %arg4: memref<1x1024xf32, #tpu.memory_space<vmem>>, %arg5: memref<1024x128xf32, #tpu.memory_space<vmem>>, %arg6: memref<1x128xf32, #tpu.memory_space<vmem>>, %arg7: memref<16x128xf32, #tpu.memory_space<vmem>>, %arg8: memref<16x1024xf32, #tpu.memory_space<vmem>>) attributes {dimension_semantics = [#tpu.dimension_semantics<parallel>, #tpu.dimension_semantics<arbitrary>], iteration_bounds = array<i64: 1, 1>, scalar_prefetch = 0 : i64, scratch_operands = 1 : i64, tpu.core_type = #tpu.core_type<tc>, window_params = [{transform_indices = @transform_0, window_bounds = array<i64: 16, 32>}, {pipeline_mode = #tpu.pipeline_mode<synchronous>, transform_indices = @transform_1, window_bounds = array<i64: 32, 1024>}, {pipeline_mode = #tpu.pipeline_mode<synchronous>, transform_indices = @transform_2, window_bounds = array<i64: 1, 1024>}, {pipeline_mode = #tpu.pipeline_mode<synchronous>, transform_indices = @transform_3, window_bounds = array<i64: 1024, 128>}, {pipeline_mode = #tpu.pipeline_mode<synchronous>, transform_indices = @transform_4, window_bounds = array<i64: 1, 128>}, {transform_indices = @transform_5, window_bounds = array<i64: 16, 128>}]} {
    %c0_i32 = arith.constant 0 : i32
    %0 = arith.cmpi eq, %arg1, %c0_i32 : i32
    %1 = arith.extui %0 : i1 to i32
    %c0_i32_0 = arith.constant 0 : i32
    %2 = arith.cmpi ne, %1, %c0_i32_0 : i32
    scf.if %2 {
      %c0_10 = arith.constant 0 : index
      %c0_11 = arith.constant 0 : index
      %12 = vector.load %arg4[%c0_10, %c0_11] : memref<1x1024xf32, #tpu.memory_space<vmem>>, vector<1x1024xf32>
      %13 = vector.shape_cast %12 : vector<1x1024xf32> to vector<1x1024xf32>
      %14 = vector.broadcast %13 : vector<1x1024xf32> to vector<16x1024xf32>
      %c0_12 = arith.constant 0 : index
      %c0_13 = arith.constant 0 : index
      %15 = vector.load %arg8[%c0_12, %c0_13] : memref<16x1024xf32, #tpu.memory_space<vmem>>, vector<16x1024xf32>
      tpu.vector_store %arg8[%c0_12, %c0_13], %14 {strides = array<i32>} : memref<16x1024xf32, #tpu.memory_space<vmem>>, vector<16x1024xf32>,
    } else {
    }
    %c0 = arith.constant 0 : index
    %c0_1 = arith.constant 0 : index
    %3 = vector.load %arg8[%c0, %c0_1] : memref<16x1024xf32, #tpu.memory_space<vmem>>, vector<16x1024xf32>
    %c0_2 = arith.constant 0 : index
    %c0_3 = arith.constant 0 : index
    %4 = vector.load %arg2[%c0_2, %c0_3] : memref<16x32xf32, #tpu.memory_space<vmem>>, vector<16x32xf32>
    %c0_4 = arith.constant 0 : index
    %c0_5 = arith.constant 0 : index
    %5 = vector.load %arg3[%c0_4, %c0_5] : memref<32x1024xf32, #tpu.memory_space<vmem>>, vector<32x1024xf32>
    %cst = arith.constant dense<0.000000e+00> : vector<16x1024xf32>
    %6 = tpu.matmul %4, %5, %cst {dimension_numbers = #tpu.dot_dimension_numbers<[1], [0], [0], [1], [0, 0, 1, 1], [], []>} : vector<16x32xf32>, vector<32x1024xf32>, vector<16x1024xf32> -> vector<16x1024xf32>
    %7 = arith.addf %3, %6 : vector<16x1024xf32>
    %c0_6 = arith.constant 0 : index
    %c0_7 = arith.constant 0 : index
    %8 = vector.load %arg8[%c0_6, %c0_7] : memref<16x1024xf32, #tpu.memory_space<vmem>>, vector<16x1024xf32>
    tpu.vector_store %arg8[%c0_6, %c0_7], %7 {strides = array<i32>} : memref<16x1024xf32, #tpu.memory_space<vmem>>, vector<16x1024xf32>,
    %c0_i32_8 = arith.constant 0 : i32
    %9 = arith.cmpi eq, %arg1, %c0_i32_8 : i32
    %10 = arith.extui %9 : i1 to i32
    %c0_i32_9 = arith.constant 0 : i32
    %11 = arith.cmpi ne, %10, %c0_i32_9 : i32
    scf.if %11 {
      %c0_10 = arith.constant 0 : index
      %c0_11 = arith.constant 0 : index
      %12 = vector.load %arg8[%c0_10, %c0_11] : memref<16x1024xf32, #tpu.memory_space<vmem>>, vector<16x1024xf32>
      %c0_12 = arith.constant 0 : index
      %c0_13 = arith.constant 0 : index
      %13 = vector.load %arg5[%c0_12, %c0_13] : memref<1024x128xf32, #tpu.memory_space<vmem>>, vector<1024x128xf32>
      %cst_14 = arith.constant dense<0.000000e+00> : vector<16x128xf32>
      %14 = tpu.matmul %12, %13, %cst_14 {dimension_numbers = #tpu.dot_dimension_numbers<[1], [0], [0], [1], [0, 0, 1, 1], [], []>} : vector<16x1024xf32>, vector<1024x128xf32>, vector<16x128xf32> -> vector<16x128xf32>
      %c0_15 = arith.constant 0 : index
      %c0_16 = arith.constant 0 : index
      %15 = vector.load %arg6[%c0_15, %c0_16] : memref<1x128xf32, #tpu.memory_space<vmem>>, vector<1x128xf32>
      %16 = vector.broadcast %15 : vector<1x128xf32> to vector<16x128xf32>
      %17 = arith.addf %14, %16 : vector<16x128xf32>
      %cst_17 = arith.constant dense<0xFF800000> : vector<16xf32>
      %18 = vector.multi_reduction <maximumf>, %17, %cst_17 [1] : vector<16x128xf32> to vector<16xf32>
      %19 = vector.shape_cast %18 : vector<16xf32> to vector<16x1xf32>
      %20 = vector.broadcast %19 : vector<16x1xf32> to vector<16x128xf32>
      %21 = arith.subf %17, %20 : vector<16x128xf32>
      %22 = math.exp %21 : vector<16x128xf32>
      %cst_18 = arith.constant dense<0.000000e+00> : vector<16xf32>
      %23 = vector.multi_reduction <add>, %22, %cst_18 [1] : vector<16x128xf32> to vector<16xf32>
      %24 = vector.shape_cast %23 : vector<16xf32> to vector<16x1xf32>
      %25 = tpu.reciprocal %24 : vector<16x1xf32> -> vector<16x1xf32>
      %26 = vector.broadcast %25 : vector<16x1xf32> to vector<16x128xf32>
      %27 = arith.mulf %22, %26 : vector<16x128xf32>
      %c0_19 = arith.constant 0 : index
      %c0_20 = arith.constant 0 : index
      %28 = vector.load %arg7[%c0_19, %c0_20] : memref<16x128xf32, #tpu.memory_space<vmem>>, vector<16x128xf32>
      tpu.vector_store %arg7[%c0_19, %c0_20], %27 {strides = array<i32>} : memref<16x128xf32, #tpu.memory_space<vmem>>, vector<16x128xf32>,
    } else {
    }
    return
  }
  func.func @transform_0(%arg0: i32, %arg1: i32) -> (i32, i32) {
    %c0_i32 = arith.constant 0 : i32
    return %arg0, %arg1 : i32, i32
  }
  func.func @transform_1(%arg0: i32, %arg1: i32) -> (i32, i32) {
    %c0_i32 = arith.constant 0 : i32
    %c0_i32_0 = arith.constant 0 : i32
    %c0_i32_1 = arith.constant 0 : i32
    return %c0_i32, %c0_i32_0 : i32, i32
  }
  func.func @transform_2(%arg0: i32, %arg1: i32) -> (i32, i32) {
    %c0_i32 = arith.constant 0 : i32
    %c0_i32_0 = arith.constant 0 : i32
    %c0_i32_1 = arith.constant 0 : i32
    return %c0_i32, %c0_i32_0 : i32, i32
  }
  func.func @transform_3(%arg0: i32, %arg1: i32) -> (i32, i32) {
    %c0_i32 = arith.constant 0 : i32
    %c0_i32_0 = arith.constant 0 : i32
    %c0_i32_1 = arith.constant 0 : i32
    return %c0_i32, %c0_i32_0 : i32, i32
  }
  func.func @transform_4(%arg0: i32, %arg1: i32) -> (i32, i32) {
    %c0_i32 = arith.constant 0 : i32
    %c0_i32_0 = arith.constant 0 : i32
    %c0_i32_1 = arith.constant 0 : i32
    return %c0_i32, %c0_i32_0 : i32, i32
  }
  func.func @transform_5(%arg0: i32, %arg1: i32) -> (i32, i32) {
    %c0_i32 = arith.constant 0 : i32
    %c0_i32_0 = arith.constant 0 : i32
    return %arg0, %c0_i32 : i32, i32
  }
}

</mosaic_0001>

<bundles_post_ra>
// kernel: tpu_custom_call.1
= control target key start
LH: loop header
LB: loop body
LE: loop exit
PB: predicated region body
PF: predicated region fallthrough
CT: control target
= control target key end

     0   :  { %10 = vsyncpa [#allocation4], 0  ;;  %s1059_s0 = inlined_call_operand.hbm [shape: f32[16,32], index: 0, kind: input, shape index: {}]   ;;  %s1060_s1 = inlined_call_operand.hbm [shape: f32[32,1024], index: 1, kind: input, shape index: {}]   ;;  %s1061_s2 = inlined_call_operand.hbm [shape: f32[1,1024], index: 2, kind: input, shape index: {}]   ;;  %s1062_s3 = inlined_call_operand.hbm [shape: f32[1024,128], index: 3, kind: input, shape index: {}]   ;;  %s1063_s4 = inlined_call_operand.vmem [shape: f32[1,128], index: 4, kind: input, shape index: {}]   ;;  %s1064_s5 = inlined_call_operand.hbm [shape: f32[16,128], index: 5, kind: output, shape index: {}]  }
   0x1   :  { %11 = vsyncpa [#allocation7], 0 }
   0x2   :  { %12 = vsyncpa [#allocation10], 0  ;;  %s31_s20 = sshll.u32 %s1060_s1, 4  ;;  %s32_s20 = int_to_ptr.hbm [resolvable:$true] %s31_s20 }
   0x3   :  { %13 = vsyncpa [#allocation5], 0  ;;  %s957_s21 = smov [#allocation6]   ;;  %s18_s25 = sshll.u32 %s1059_s0, 4  ;;  %s19_s25 = int_to_ptr.hbm [resolvable:$true] %s18_s25 }
   0x4   :  { %s33_s22 = sshll.u32 %s957_s21, 4  ;;  %s958_s26 = smov 1024   ;;  %s34_s22 = int_to_ptr.vmem [resolvable:$true] %s33_s22 }
   0x5   :  { %s959_s27 = smov 64   ;;  %s960_s28 = smov [#allocation3]  }
   0x6   :  { %39 = dma.hbm_to_vmem [thread:$0]  %s32_s20, 4096, %s34_s22, [#allocation7], %s958_s26, %s958_s26, %s959_s27  }
   0x7   :  { %s20_s29 = sshll.u32 %s960_s28, 4  ;;  %s961_s30 = smov 128   ;;  %s21_s29 = int_to_ptr.vmem [resolvable:$true] %s20_s29 }
   0x8   :  { %s962_s6 = smov 8   ;;  %s45_s8 = sshll.u32 %s1061_s2, 4  ;;  %s46_s8 = int_to_ptr.hbm [resolvable:$true] %s45_s8 }
   0x9   :  { %26 = dma.hbm_to_vmem [thread:$0]  %s19_s25, 256, %s21_s29, [#allocation4], %s961_s30, %s961_s30, %s962_s6  }
   0xa   :  { %s963_s9 = smov [#allocation8]   ;;  %s55_s12 = sshll.u32 %s1062_s3, 4  ;;  %s56_s12 = int_to_ptr.hbm [resolvable:$true] %s55_s12 }
   0xb   :  { %s47_s0 = sshll.u32 %s963_s9, 4  ;;  %s964_s13 = smov [#allocation9]   ;;  %s48_s0 = int_to_ptr.vmem [resolvable:$true] %s47_s0 }
   0xc   :  { %50 = dma.hbm_to_vmem [thread:$0]  %s46_s8, 128, %s48_s0, [#allocation7]  }
   0xd   :  { %s57_s14 = sshll.u32 %s964_s13, 4  ;;  %s58_s14 = int_to_ptr.vmem [resolvable:$true] %s57_s14 }
   0xe   :  { %63 = dma.hbm_to_vmem [thread:$0]  %s56_s12, 16384, %s58_s14, [#allocation10], %s961_s30, %s961_s30, %s962_s6  }
   0xf   :  { %949 = dma.done.wait [#allocation4], 256  }
  0x10   :  { %950 = vsyncadd [#allocation4], 4294967040 }
  0x11   :  { %951 = dma.done.wait [#allocation7], 4224  }
  0x12   :  { %952 = vsyncadd [#allocation7], 4294963072 }
  0x13   :  { %953 = dma.done.wait [#allocation10], 16384  }
  0x14   :  { %954 = vsyncadd [#allocation10], 4294950912  ;;  %v162_v0 = vld [vmem:[#allocation6 + $0xc0] sm:$0xff]  ;;  %v164_v1 = vld [vmem:[#allocation6 + $0xd0] sm:$0xff]  ;;  %vm170_vm0 = vcmask 261120   ;;  %s780_s18 = sshll.u32 %s1064_s5, 4  ;;  %s781_s18 = int_to_ptr.hbm [resolvable:$true] %s780_s18 }
  0x15   :  { %v154_v2 = vld [vmem:[#allocation6 + $0x80] sm:$0xff]  ;;  %189 = vmatpush.msra.mxu0 %v162_v0  ;;  %235 = vmatpush.msra.mxu2 %v164_v1  ;;  %v163_v3 = vld [vmem:[#allocation6 + $0xc8] sm:$0xff]  ;;  %v156_v4 = vld [vmem:[#allocation6 + $0x90] sm:$0xff] }
  0x16   :  { %v165_v5 = vld [vmem:[#allocation6 + $0xd8] sm:$0xff]  ;;  %212 = vmatpush.msra.mxu1 %v163_v3  ;;  %v146_v6 = vld [vmem:[#allocation6 + $0x40] sm:$0xff]  ;;  %v155_v7 = vld [vmem:[#allocation6 + $0x88] sm:$0xff] }
  0x17   :  { %258 = vmatpush.msra.mxu3 %v165_v5  ;;  %v148_v8 = vld [vmem:[#allocation6 + $0x50] sm:$0xff]  ;;  %190 = vmatpush.msra.mxu0 %v154_v2  ;;  %v157_v9 = vld [vmem:[#allocation6 + $0x98] sm:$0xff]  ;;  %v147_v10 = vld [vmem:[#allocation6 + $0x48] sm:$0xff] }
  0x18   :  { %236 = vmatpush.msra.mxu2 %v156_v4  ;;  %213 = vmatpush.msra.mxu1 %v155_v7  ;;  %v138_v11 = vld [vmem:[#allocation6] sm:$0xff]  ;;  %v140_v12 = vld [vmem:[#allocation6 + $0x10] sm:$0xff]  ;;  %v149_v13 = vld [vmem:[#allocation6 + $0x58] sm:$0xff] }
  0x19   :  { %259 = vmatpush.msra.mxu3 %v157_v9  ;;  %191 = vmatpush.msra.mxu0 %v146_v6  ;;  %v1014_v14 = vld [vmem:[#allocation3] sm:$0xff]  ;;  %v139_v16 = vld [vmem:[#allocation6 + $0x8] sm:$0xff]  ;;  %v141_v17 = vld [vmem:[#allocation6 + $0x18] sm:$0xff] }
  0x1a   :  { %237 = vmatpush.msra.mxu2 %v148_v8  ;;  %214 = vmatpush.msra.mxu1 %v147_v10  ;;  %v168_v15 = vld [vmem:[#allocation6 + $0xf0] sm:$0xff]  ;;  %v169_v19 = vld [vmem:[#allocation6 + $0xf8] sm:$0xff]  ;;  %v166_v20 = vld [vmem:[#allocation6 + $0xe0] sm:$0xff] }
  0x1b   :  { %260 = vmatpush.msra.mxu3 %v149_v13  ;;  %192 = vmatpush.msra.mxu0 %v138_v11  ;;  %v160_v18 = vld [vmem:[#allocation6 + $0xb0] sm:$0xff]  ;;  %v167_v22 = vld [vmem:[#allocation6 + $0xe8] sm:$0xff]  ;;  %v161_v23 = vld [vmem:[#allocation6 + $0xb8] sm:$0xff] }
  0x1c   :  { %238 = vmatpush.msra.mxu2 %v140_v12  ;;  %795 = vmatmul.msk.f32.vlgmr.msra.gmra.mxu0 %vm170_vm0, %v1014_v14  ;;  %v152_v21 = vld [vmem:[#allocation6 + $0x70] sm:$0xff]  ;;  %v158_v24 = vld [vmem:[#allocation6 + $0xa0] sm:$0xff]  ;;  %v159_v26 = vld [vmem:[#allocation6 + $0xa8] sm:$0xff] }
  0x1d   :  { %799 = vmatmul.msk.f32.vlgmr.msra.gmra.mxu2 %vm170_vm0, %v1014_v14  ;;  %215 = vmatpush.msra.mxu1 %v139_v16  ;;  %v144_v25 = vld [vmem:[#allocation6 + $0x30] sm:$0xff]  ;;  %v1024_v27 = vld [vmem:[#allocation3 + $0x8] sm:$0xff]  ;;  %v150_v29 = vld [vmem:[#allocation6 + $0x60] sm:$0xff] }
  0x1e   :  { %327 = vmatpush.msrb.mxu2 %v168_v15  ;;  %261 = vmatpush.msra.mxu3 %v141_v17  ;;  %v153_v28 = vld [vmem:[#allocation6 + $0x78] sm:$0xff]  ;;  %v459_v30 = vld [vmem:[#allocation9 + $0x178] sm:$0xff]  ;;  %v151_v33 = vld [vmem:[#allocation6 + $0x68] sm:$0xff] }
  0x1f   :  { %797 = vmatmul.msk.f32.vlgmr.msra.gmra.mxu1 %vm170_vm0, %v1014_v14  ;;  %801 = vmatmul.msk.f32.vlgmr.msra.gmra.mxu3 %vm170_vm0, %v1014_v14  ;;  %v142_v31 = vld [vmem:[#allocation6 + $0x20] sm:$0xff]  ;;  %v145_v32 = vld [vmem:[#allocation6 + $0x38] sm:$0xff]  ;;  %v143_v36 = vld [vmem:[#allocation6 + $0x28] sm:$0xff] }
  0x20   :  { %328 = vmatpush.msrb.mxu2 %v160_v18  ;;  %350 = vmatpush.msrb.mxu3 %v169_v19  ;;  %v427_v34 = vld [vmem:[#allocation9 + $0x78] sm:$0xff]  ;;  %v458_v35 = vld [vmem:[#allocation9 + $0x170] sm:$0xff]  ;;  %v425_v40 = vld [vmem:[#allocation9 + $0x68] sm:$0xff] }
  0x21   :  { %281 = vmatpush.msrb.mxu0 %v166_v20  ;;  %304 = vmatpush.msrb.mxu1 %v167_v22  ;;  %v475_v37 = vld [vmem:[#allocation9 + $0x1f8] sm:$0xff]  ;;  %v426_v38 = vld [vmem:[#allocation9 + $0x70] sm:$0xff]  ;;  %v457_v42 = vld [vmem:[#allocation9 + $0x168] sm:$0xff] }
  0x22   :  { %329 = vmatpush.msrb.mxu2 %v152_v21  ;;  %351 = vmatpush.msrb.mxu3 %v161_v23  ;;  %v443_v39 = vld [vmem:[#allocation9 + $0xf8] sm:$0xff]  ;;  %v442_v41 = vld [vmem:[#allocation9 + $0xf0] sm:$0xff]  ;;  %v424_v43 = vld [vmem:[#allocation9 + $0x60] sm:$0xff] }
  0x23   :  { %282 = vmatpush.msrb.mxu0 %v158_v24  ;;  %305 = vmatpush.msrb.mxu1 %v159_v26  ;;  %v441_v44 = vld [vmem:[#allocation9 + $0xe8] sm:$0xff]  ;;  %v474_v45 = vld [vmem:[#allocation9 + $0x1f0] sm:$0xff]  ;;  %v423_v46 = vld [vmem:[#allocation9 + $0x58] sm:$0xff] }
  0x24   :  { %330 = vmatpush.msrb.mxu2 %v144_v25  ;;  %796 = vmatmul.msk.f32.gmra.mxu0 %vm170_vm0, %v1024_v27  ;;  %v456_v47 = vld [vmem:[#allocation9 + $0x160] sm:$0xff]  ;;  %v473_v49 = vld [vmem:[#allocation9 + $0x1e8] sm:$0xff]  ;;  %v422_v50 = vld [vmem:[#allocation9 + $0x50] sm:$0xff] }
  0x25   :  { %800 = vmatmul.msk.f32.gmra.mxu2 %vm170_vm0, %v1024_v27  ;;  %352 = vmatpush.msrb.mxu3 %v153_v28  ;;  %v440_v48 = vld [vmem:[#allocation9 + $0xe0] sm:$0xff]  ;;  %v455_v51 = vld [vmem:[#allocation9 + $0x158] sm:$0xff]  ;;  %v421_v53 = vld [vmem:[#allocation9 + $0x48] sm:$0xff] }
  0x26   :  { %283 = vmatpush.msrb.mxu0 %v150_v29  ;;  %590 = vmatpush.msra.mxu2 %v459_v30  ;;  %v439_v52 = vld [vmem:[#allocation9 + $0xd8] sm:$0xff]  ;;  %v472_v54 = vld [vmem:[#allocation9 + $0x1e0] sm:$0xff]  ;;  %v438_v55 = vld [vmem:[#allocation9 + $0xd0] sm:$0xff] }
  0x27   :  { %798 = vmatmul.msk.f32.gmra.mxu1 %vm170_vm0, %v1024_v27  ;;  %802 = vmatmul.msk.f32.gmra.mxu3 %vm170_vm0, %v1024_v27  ;;  %v420_v56 = vld [vmem:[#allocation9 + $0x40] sm:$0xff]  ;;  %v454_v57 = vld [vmem:[#allocation9 + $0x150] sm:$0xff]  ;;  %v437_v58 = vld [vmem:[#allocation9 + $0xc8] sm:$0xff] }
  0x28   :  { %284 = vmatpush.msrb.mxu0 %v142_v31  ;;  %353 = vmatpush.msrb.mxu3 %v145_v32  ;;  %v471_v59 = vld [vmem:[#allocation9 + $0x1d8] sm:$0xff]  ;;  %v453_v61 = vld [vmem:[#allocation9 + $0x148] sm:$0xff]  ;;  %v436_v62 = vld [vmem:[#allocation9 + $0xc0] sm:$0xff] }
  0x29   :  { %306 = vmatpush.msrb.mxu1 %v151_v33  ;;  %591 = vmatpush.msra.mxu2 %v458_v35  ;;  %v419_v60 = vld [vmem:[#allocation9 + $0x38] sm:$0xff]  ;;  %v470_v63 = vld [vmem:[#allocation9 + $0x1d0] sm:$0xff]  ;;  %v452_v1 = vld [vmem:[#allocation9 + $0x140] sm:$0xff] }
  0x2a   :  { %544 = vmatpush.msra.mxu0 %v427_v34  ;;  %613 = vmatpush.msra.mxu3 %v475_v37  ;;  %v418_v0 = vld [vmem:[#allocation9 + $0x30] sm:$0xff]  ;;  %v435_v2 = vld [vmem:[#allocation9 + $0xb8] sm:$0xff]  ;;  %v469_v3 = vld [vmem:[#allocation9 + $0x1c8] sm:$0xff] }
  0x2b   :  { %307 = vmatpush.msrb.mxu1 %v143_v36  ;;  %592 = vmatpush.msra.mxu2 %v457_v42  ;;  %v417_v4 = vld [vmem:[#allocation9 + $0x28] sm:$0xff]  ;;  %v451_v5 = vld [vmem:[#allocation9 + $0x138] sm:$0xff]  ;;  %v434_v6 = vld [vmem:[#allocation9 + $0xb0] sm:$0xff] }
  0x2c   :  { %545 = vmatpush.msra.mxu0 %v426_v38  ;;  %614 = vmatpush.msra.mxu3 %v474_v45  ;;  %v468_v7 = vld [vmem:[#allocation9 + $0x1c0] sm:$0xff]  ;;  %v450_v9 = vld [vmem:[#allocation9 + $0x130] sm:$0xff]  ;;  %v433_v10 = vld [vmem:[#allocation9 + $0xa8] sm:$0xff] }
  0x2d   :  { %567 = vmatpush.msra.mxu1 %v443_v39  ;;  %803 = vmatmul.msk.f32.vlgmr.msrb.gmra.mxu0 %vm170_vm0, %v1014_v14  ;;  %v416_v8 = vld [vmem:[#allocation9 + $0x20] sm:$0xff]  ;;  %v467_v11 = vld [vmem:[#allocation9 + $0x1b8] sm:$0xff]  ;;  %v449_v13 = vld [vmem:[#allocation9 + $0x128] sm:$0xff] }
  0x2e   :  { %807 = vmatmul.msk.f32.vlgmr.msrb.gmra.mxu2 %vm170_vm0, %v1014_v14  ;;  %546 = vmatpush.msra.mxu0 %v425_v40  ;;  %v415_v12 = vld [vmem:[#allocation9 + $0x18] sm:$0xff]  ;;  %v466_v15 = vld [vmem:[#allocation9 + $0x1b0] sm:$0xff]  ;;  %v448_v17 = vld [vmem:[#allocation9 + $0x120] sm:$0xff] }
  0x2f   :  { %568 = vmatpush.msra.mxu1 %v442_v41  ;;  %809 = vmatmul.msk.f32.vlgmr.msrb.gmra.mxu3 %vm170_vm0, %v1014_v14  ;;  %v414_v16 = vld [vmem:[#allocation9 + $0x10] sm:$0xff]  ;;  %v431_v18 = vld [vmem:[#allocation9 + $0x98] sm:$0xff]  ;;  %v465_v19 = vld [vmem:[#allocation9 + $0x1a8] sm:$0xff] }
  0x30   :  { %805 = vmatmul.msk.f32.vlgmr.msrb.gmra.mxu1 %vm170_vm0, %v1014_v14  ;;  %547 = vmatpush.msra.mxu0 %v424_v43  ;;  %v432_v14 = vld [vmem:[#allocation9 + $0xa0] sm:$0xff]  ;;  %v413_v20 = vld [vmem:[#allocation9 + $0x8] sm:$0xff]  ;;  %v447_v21 = vld [vmem:[#allocation9 + $0x118] sm:$0xff] }
  0x31   :  { %569 = vmatpush.msra.mxu1 %v441_v44  ;;  %593 = vmatpush.msra.mxu2 %v456_v47  ;;  %v430_v22 = vld [vmem:[#allocation9 + $0x90] sm:$0xff]  ;;  %v464_v23 = vld [vmem:[#allocation9 + $0x1a0] sm:$0xff]  ;;  %v429_v26 = vld [vmem:[#allocation9 + $0x88] sm:$0xff] }
  0x32   :  { %548 = vmatpush.msra.mxu0 %v423_v46  ;;  %615 = vmatpush.msra.mxu3 %v473_v49  ;;  %v412_v24 = vld [vmem:[#allocation9] sm:$0xff]  ;;  %v446_v25 = vld [vmem:[#allocation9 + $0x110] sm:$0xff]  ;;  %v463_v28 = vld [vmem:[#allocation9 + $0x198] sm:$0xff] }
  0x33   :  { %570 = vmatpush.msra.mxu1 %v440_v48  ;;  %594 = vmatpush.msra.mxu2 %v455_v51  ;;  %v445_v29 = vld [vmem:[#allocation9 + $0x108] sm:$0xff]  ;;  %v428_v30 = vld [vmem:[#allocation9 + $0x80] sm:$0xff]  ;;  %v490_v31 = vld [vmem:[#allocation9 + $0x270] sm:$0xff] }
  0x34   :  { %549 = vmatpush.msra.mxu0 %v422_v50  ;;  %616 = vmatpush.msra.mxu3 %v472_v54  ;;  %v507_v32 = vld [vmem:[#allocation9 + $0x2f8] sm:$0xff]  ;;  %v462_v33 = vld [vmem:[#allocation9 + $0x190] sm:$0xff]  ;;  %v489_v34 = vld [vmem:[#allocation9 + $0x268] sm:$0xff] }
  0x35   :  { %804 = vmatmul.msk.f32.gmra.mxu0 %vm170_vm0, %v1024_v27  ;;  %571 = vmatpush.msra.mxu1 %v439_v52  ;;  %v444_v35 = vld [vmem:[#allocation9 + $0x100] sm:$0xff]  ;;  %v506_v36 = vld [vmem:[#allocation9 + $0x2f0] sm:$0xff]  ;;  %v461_v37 = vld [vmem:[#allocation9 + $0x188] sm:$0xff] }
  0x36   :  { %808 = vmatmul.msk.f32.gmra.mxu2 %vm170_vm0, %v1024_v27  ;;  %550 = vmatpush.msra.mxu0 %v421_v53  ;;  %v488_v38 = vld [vmem:[#allocation9 + $0x260] sm:$0xff]  ;;  %v523_v39 = vld [vmem:[#allocation9 + $0x378] sm:$0xff]  ;;  %v505_v40 = vld [vmem:[#allocation9 + $0x2e8] sm:$0xff] }
  0x37   :  { %810 = vmatmul.msk.f32.gmra.mxu3 %vm170_vm0, %v1024_v27  ;;  %572 = vmatpush.msra.mxu1 %v438_v55  ;;  %v460_v41 = vld [vmem:[#allocation9 + $0x180] sm:$0xff]  ;;  %v487_v42 = vld [vmem:[#allocation9 + $0x258] sm:$0xff]  ;;  %v522_v43 = vld [vmem:[#allocation9 + $0x370] sm:$0xff] }
  0x38   :  { %806 = vmatmul.msk.f32.gmra.mxu1 %vm170_vm0, %v1024_v27  ;;  %551 = vmatpush.msra.mxu0 %v420_v56  ;;  %v491_v27 = vld [vmem:[#allocation9 + $0x278] sm:$0xff]  ;;  %v504_v44 = vld [vmem:[#allocation9 + $0x2e0] sm:$0xff]  ;;  %v486_v46 = vld [vmem:[#allocation9 + $0x250] sm:$0xff] }
  0x39   :  { %595 = vmatpush.msra.mxu2 %v454_v57  ;;  %573 = vmatpush.msra.mxu1 %v437_v58  ;;  %v539_v45 = vld [vmem:[#allocation9 + $0x3f8] sm:$0xff]  ;;  %v521_v47 = vld [vmem:[#allocation9 + $0x368] sm:$0xff]  ;;  %v538_v49 = vld [vmem:[#allocation9 + $0x3f0] sm:$0xff] }
  0x3a   :  { %617 = vmatpush.msra.mxu3 %v471_v59  ;;  %552 = vmatpush.msra.mxu0 %v419_v60  ;;  %v503_v48 = vld [vmem:[#allocation9 + $0x2d8] sm:$0xff]  ;;  %v485_v50 = vld [vmem:[#allocation9 + $0x248] sm:$0xff]  ;;  %v502_v51 = vld [vmem:[#allocation9 + $0x2d0] sm:$0xff] }
  0x3b   :  { %596 = vmatpush.msra.mxu2 %v453_v61  ;;  %574 = vmatpush.msra.mxu1 %v436_v62  ;;  %v520_v52 = vld [vmem:[#allocation9 + $0x360] sm:$0xff]  ;;  %v537_v53 = vld [vmem:[#allocation9 + $0x3e8] sm:$0xff]  ;;  %v519_v56 = vld [vmem:[#allocation9 + $0x358] sm:$0xff] }
  0x3c   :  { %618 = vmatpush.msra.mxu3 %v470_v63  ;;  %553 = vmatpush.msra.mxu0 %v418_v0  ;;  %v484_v54 = vld [vmem:[#allocation9 + $0x240] sm:$0xff]  ;;  %v501_v55 = vld [vmem:[#allocation9 + $0x2c8] sm:$0xff]  ;;  %v483_v58 = vld [vmem:[#allocation9 + $0x238] sm:$0xff] }
  0x3d   :  { %597 = vmatpush.msra.mxu2 %v452_v1  ;;  %575 = vmatpush.msra.mxu1 %v435_v2  ;;  %v536_v57 = vld [vmem:[#allocation9 + $0x3e0] sm:$0xff]  ;;  %v518_v60 = vld [vmem:[#allocation9 + $0x350] sm:$0xff]  ;;  %v535_v61 = vld [vmem:[#allocation9 + $0x3d8] sm:$0xff] }
  0x3e   :  { %619 = vmatpush.msra.mxu3 %v469_v3  ;;  %554 = vmatpush.msra.mxu0 %v417_v4  ;;  %v500_v59 = vld [vmem:[#allocation9 + $0x2c0] sm:$0xff]  ;;  %v482_v62 = vld [vmem:[#allocation9 + $0x230] sm:$0xff]  ;;  %v499_v63 = vld [vmem:[#allocation9 + $0x2b8] sm:$0xff] }
  0x3f   :  { %598 = vmatpush.msra.mxu2 %v451_v5  ;;  %576 = vmatpush.msra.mxu1 %v434_v6  ;;  %v517_v0 = vld [vmem:[#allocation9 + $0x348] sm:$0xff]  ;;  %v534_v1 = vld [vmem:[#allocation9 + $0x3d0] sm:$0xff]  ;;  %v516_v4 = vld [vmem:[#allocation9 + $0x340] sm:$0xff] }
  0x40   :  { %620 = vmatpush.msra.mxu3 %v468_v7  ;;  %555 = vmatpush.msra.mxu0 %v416_v8  ;;  %v481_v2 = vld [vmem:[#allocation9 + $0x228] sm:$0xff]  ;;  %v498_v3 = vld [vmem:[#allocation9 + $0x2b0] sm:$0xff]  ;;  %v480_v6 = vld [vmem:[#allocation9 + $0x220] sm:$0xff] }
  0x41   :  { %599 = vmatpush.msra.mxu2 %v450_v9  ;;  %577 = vmatpush.msra.mxu1 %v433_v10  ;;  %v533_v5 = vld [vmem:[#allocation9 + $0x3c8] sm:$0xff]  ;;  %v515_v8 = vld [vmem:[#allocation9 + $0x338] sm:$0xff]  ;;  %v532_v9 = vld [vmem:[#allocation9 + $0x3c0] sm:$0xff] }
  0x42   :  { %621 = vmatpush.msra.mxu3 %v467_v11  ;;  %556 = vmatpush.msra.mxu0 %v415_v12  ;;  %v497_v7 = vld [vmem:[#allocation9 + $0x2a8] sm:$0xff]  ;;  %v479_v10 = vld [vmem:[#allocation9 + $0x218] sm:$0xff]  ;;  %v496_v11 = vld [vmem:[#allocation9 + $0x2a0] sm:$0xff] }
  0x43   :  { %600 = vmatpush.msra.mxu2 %v449_v13  ;;  %578 = vmatpush.msra.mxu1 %v432_v14  ;;  %v514_v12 = vld [vmem:[#allocation9 + $0x330] sm:$0xff]  ;;  %v531_v13 = vld [vmem:[#allocation9 + $0x3b8] sm:$0xff] }
  0x44   :  { %622 = vmatpush.msra.mxu3 %v466_v15  ;;  %557 = vmatpush.msra.mxu0 %v414_v16  ;;  %v478_v14 = vld [vmem:[#allocation9 + $0x210] sm:$0xff]  ;;  %v495_v15 = vld [vmem:[#allocation9 + $0x298] sm:$0xff]  ;;  %v513_v16 = vld [vmem:[#allocation9 + $0x328] sm:$0xff] }
  0x45   :  { %601 = vmatpush.msra.mxu2 %v448_v17  ;;  %579 = vmatpush.msra.mxu1 %v431_v18  ;;  %v530_v17 = vld [vmem:[#allocation9 + $0x3b0] sm:$0xff]  ;;  %v477_v18 = vld [vmem:[#allocation9 + $0x208] sm:$0xff] }
  0x46   :  { %623 = vmatpush.msra.mxu3 %v465_v19  ;;  %558 = vmatpush.msra.mxu0 %v413_v20  ;;  %v494_v19 = vld [vmem:[#allocation9 + $0x290] sm:$0xff]  ;;  %v512_v20 = vld [vmem:[#allocation9 + $0x320] sm:$0xff] }
  0x47   :  { %602 = vmatpush.msra.mxu2 %v447_v21  ;;  %580 = vmatpush.msra.mxu1 %v430_v22  ;;  %v529_v21 = vld [vmem:[#allocation9 + $0x3a8] sm:$0xff]  ;;  %v476_v22 = vld [vmem:[#allocation9 + $0x200] sm:$0xff] }
  0x48   :  { %624 = vmatpush.msra.mxu3 %v464_v23  ;;  %559 = vmatpush.msra.mxu0 %v412_v24  ;;  %v493_v23 = vld [vmem:[#allocation9 + $0x288] sm:$0xff]  ;;  %v511_v24 = vld [vmem:[#allocation9 + $0x318] sm:$0xff] }
  0x49   :  { %603 = vmatpush.msra.mxu2 %v446_v25  ;;  %581 = vmatpush.msra.mxu1 %v429_v26  ;;  %v528_v25 = vld [vmem:[#allocation9 + $0x3a0] sm:$0xff] }
  0x4a   :  { %636 = vmatpush.msrb.mxu0 %v491_v27  ;;  %625 = vmatpush.msra.mxu3 %v463_v28  ;;  %v492_v26 = vld [vmem:[#allocation9 + $0x280] sm:$0xff]  ;;  %v510_v27 = vld [vmem:[#allocation9 + $0x310] sm:$0xff]  ;;  %v527_v28 = vld [vmem:[#allocation9 + $0x398] sm:$0xff] }
  0x4b   :  { %604 = vmatpush.msra.mxu2 %v445_v29  ;;  %582 = vmatpush.msra.mxu1 %v428_v30  ;;  %v509_v29 = vld [vmem:[#allocation9 + $0x308] sm:$0xff]  ;;  %v526_v30 = vld [vmem:[#allocation9 + $0x390] sm:$0xff] }
  0x4c   :  { %637 = vmatpush.msrb.mxu0 %v490_v31  ;;  %626 = vmatpush.msra.mxu3 %v462_v33  ;;  %v508_v31 = vld [vmem:[#allocation9 + $0x300] sm:$0xff]  ;;  %v86_v33 = vld [vmem:[#allocation8] sm:$0xff] }
  0x4d   :  { %659 = vmatpush.msrb.mxu1 %v507_v32  ;;  %605 = vmatpush.msra.mxu2 %v444_v35  ;;  %v525_v32 = vld [vmem:[#allocation9 + $0x388] sm:$0xff]  ;;  %v88_v35 = vperm.slane %v86_v33, 0 }
  0x4e   :  { %638 = vmatpush.msrb.mxu0 %v489_v34  ;;  %627 = vmatpush.msra.mxu3 %v461_v37  ;;  %v524_v34 = vld [vmem:[#allocation9 + $0x380] sm:$0xff] }
  0x4f   :  { %660 = vmatpush.msrb.mxu1 %v506_v36  ;;  %682 = vmatpush.msrb.mxu2 %v523_v39  ;;  %v89_v36 = vperm.slane %v86_v33, 1 }
  0x50   :  { %639 = vmatpush.msrb.mxu0 %v488_v38  ;;  %628 = vmatpush.msra.mxu3 %v460_v41  ;;  %v90_v41 = vperm.slane %v86_v33, 2 }
  0x51   :  { %661 = vmatpush.msrb.mxu1 %v505_v40  ;;  %683 = vmatpush.msrb.mxu2 %v522_v43  ;;  %v91_v43 = vperm.slane %v86_v33, 3 }
  0x52   :  { %640 = vmatpush.msrb.mxu0 %v487_v42  ;;  %705 = vmatpush.msrb.mxu3 %v539_v45 }
  0x53   :  { %662 = vmatpush.msrb.mxu1 %v504_v44  ;;  %684 = vmatpush.msrb.mxu2 %v521_v47 }
  0x54   :  { %641 = vmatpush.msrb.mxu0 %v486_v46  ;;  %706 = vmatpush.msrb.mxu3 %v538_v49 }
  0x55   :  { %663 = vmatpush.msrb.mxu1 %v503_v48  ;;  %685 = vmatpush.msrb.mxu2 %v520_v52 }
  0x56   :  { %642 = vmatpush.msrb.mxu0 %v485_v50  ;;  %707 = vmatpush.msrb.mxu3 %v537_v53 }
  0x57   :  { %664 = vmatpush.msrb.mxu1 %v502_v51  ;;  %686 = vmatpush.msrb.mxu2 %v519_v56  ;;  %v92_v51 = vperm.slane %v86_v33, 4 }
  0x58   :  { %643 = vmatpush.msrb.mxu0 %v484_v54  ;;  %708 = vmatpush.msrb.mxu3 %v536_v57  ;;  %v93_v54 = vperm.slane %v86_v33, 5 }
  0x59   :  { %665 = vmatpush.msrb.mxu1 %v501_v55  ;;  %687 = vmatpush.msrb.mxu2 %v518_v60 }
  0x5a   :  { %644 = vmatpush.msrb.mxu0 %v483_v58  ;;  %709 = vmatpush.msrb.mxu3 %v535_v61  ;;  %v94_v61 = vperm.slane %v86_v33, 6 }
  0x5b   :  { %666 = vmatpush.msrb.mxu1 %v500_v59  ;;  %688 = vmatpush.msrb.mxu2 %v517_v0 }
  0x5c   :  { %645 = vmatpush.msrb.mxu0 %v482_v62  ;;  %710 = vmatpush.msrb.mxu3 %v534_v1 }
  0x5d   :  { %667 = vmatpush.msrb.mxu1 %v499_v63  ;;  %689 = vmatpush.msrb.mxu2 %v516_v4  ;;  %v95_v63 = vperm.slane %v86_v33, 7 }
  0x5e   :  { %646 = vmatpush.msrb.mxu0 %v481_v2  ;;  %711 = vmatpush.msrb.mxu3 %v533_v5 }
  0x5f   :  { %668 = vmatpush.msrb.mxu1 %v498_v3  ;;  %690 = vmatpush.msrb.mxu2 %v515_v8 }
  0x60   :  { %647 = vmatpush.msrb.mxu0 %v480_v6  ;;  %712 = vmatpush.msrb.mxu3 %v532_v9 }
  0x61   :  { %669 = vmatpush.msrb.mxu1 %v497_v7  ;;  %691 = vmatpush.msrb.mxu2 %v514_v12 }
  0x62   :  { %648 = vmatpush.msrb.mxu0 %v479_v10  ;;  %713 = vmatpush.msrb.mxu3 %v531_v13  ;;  %v820_v13 = vld [vmem:[%s1063_s4] ss:$0 sm:$0xff]  ;;  %s965_s4 = smov [#allocation11]  }
  0x63   :  { %670 = vmatpush.msrb.mxu1 %v496_v11  ;;  %692 = vmatpush.msrb.mxu2 %v513_v16  ;;  %s778_s15 = sshll.u32 %s965_s4, 4  ;;  %s779_s15 = int_to_ptr.vmem [resolvable:$true] %s778_s15 }
  0x64   :  { %649 = vmatpush.msrb.mxu0 %v478_v14  ;;  %714 = vmatpush.msrb.mxu3 %v530_v17 }
  0x65   :  { %671 = vmatpush.msrb.mxu1 %v495_v15  ;;  %693 = vmatpush.msrb.mxu2 %v512_v20 }
  0x66   :  { %650 = vmatpush.msrb.mxu0 %v477_v18  ;;  %715 = vmatpush.msrb.mxu3 %v529_v21 }
  0x67   :  { %672 = vmatpush.msrb.mxu1 %v494_v19  ;;  %694 = vmatpush.msrb.mxu2 %v511_v24 }
  0x68   :  { %651 = vmatpush.msrb.mxu0 %v476_v22  ;;  %716 = vmatpush.msrb.mxu3 %v528_v25 }
  0x69   :  { %673 = vmatpush.msrb.mxu1 %v493_v23  ;;  %695 = vmatpush.msrb.mxu2 %v510_v27 }
  0x6a   :  { %717 = vmatpush.msrb.mxu3 %v527_v28 }
  0x6b   :  { %674 = vmatpush.msrb.mxu1 %v492_v26  ;;  %696 = vmatpush.msrb.mxu2 %v509_v29 }
  0x6c   :  { %718 = vmatpush.msrb.mxu3 %v526_v30 }
  0x6d   :  { %697 = vmatpush.msrb.mxu2 %v508_v31 }
  0x6e   :  { %719 = vmatpush.msrb.mxu3 %v525_v32 }
  0x70   :  { %720 = vmatpush.msrb.mxu3 %v524_v34 }
  0x99   :  { %v194_v37 = vpop.f32.mrf.mxu0 }
  0x9a   :  { %v361_v38 = vadd.f32 %v194_v37, %v88_v35 }
  0x9c   :  { %v217_v39 = vpop.f32.mrf.mxu1  ;;  %560 = vmatmul.f32.vlgmr.msra.gmra.mxu0 %v361_v38 }
  0x9d   :  { %v362_v40 = vadd.f32 %v217_v39, %v89_v36 }
  0x9f   :  { %583 = vmatmul.f32.vlgmr.msra.gmra.mxu1 %v362_v40 }
  0xa0   :  { %v240_v42 = vpop.f32.mrf.mxu2 }
  0xa1   :  { %v363_v44 = vadd.f32 %v240_v42, %v90_v41  ;;  %v197_v45 = vpop.f32.mrf.mxu0 }
  0xa2   :  { %v369_v46 = vadd.f32 %v197_v45, %v88_v35  ;;  %v263_v47 = vpop.f32.mrf.mxu3 }
  0xa3   :  { %606 = vmatmul.f32.vlgmr.msra.gmra.mxu2 %v363_v44  ;;  %v364_v48 = vadd.f32 %v263_v47, %v91_v43 }
  0xa4   :  { %v220_v49 = vpop.f32.mrf.mxu1  ;;  %563 = vmatmul.f32.gmra.mxu0 %v369_v46 }
  0xa5   :  { %v370_v50 = vadd.f32 %v220_v49, %v89_v36  ;;  %629 = vmatmul.f32.vlgmr.msra.gmra.mxu3 %v364_v48 }
  0xa7   :  { %586 = vmatmul.f32.gmra.mxu1 %v370_v50 }
  0xa8   :  { %v243_v52 = vpop.f32.mrf.mxu2 }
  0xa9   :  { %v371_v53 = vadd.f32 %v243_v52, %v90_v41 }
  0xaa   :  { %v286_v55 = vpop.f32.mrf.mxu0  ;;  %v266_v56 = vpop.f32.mrf.mxu3 }
  0xab   :  { %v365_v57 = vadd.f32 %v286_v55, %v92_v51  ;;  %609 = vmatmul.f32.gmra.mxu2 %v371_v53  ;;  %v372_v58 = vadd.f32 %v266_v56, %v91_v43 }
  0xad   :  { %v309_v59 = vpop.f32.mrf.mxu1  ;;  %652 = vmatmul.f32.vlgmr.msrb.gmra.mxu0 %v365_v57  ;;  %632 = vmatmul.f32.gmra.mxu3 %v372_v58 }
  0xae   :  { %v366_v60 = vadd.f32 %v309_v59, %v93_v54 }
  0xb0   :  { %675 = vmatmul.f32.vlgmr.msrb.gmra.mxu1 %v366_v60 }
  0xb1   :  { %v332_v62 = vpop.f32.mrf.mxu2 }
  0xb2   :  { %v367_v0 = vadd.f32 %v332_v62, %v94_v61  ;;  %v289_v1 = vpop.f32.mrf.mxu0  ;;  %v355_v3 = vpop.f32.mrf.mxu3 }
  0xb3   :  { %v373_v2 = vadd.f32 %v289_v1, %v92_v51  ;;  %v368_v4 = vadd.f32 %v355_v3, %v95_v63 }
  0xb4   :  { %698 = vmatmul.f32.vlgmr.msrb.gmra.mxu2 %v367_v0 }
  0xb5   :  { %v312_v5 = vpop.f32.mrf.mxu1  ;;  %655 = vmatmul.f32.gmra.mxu0 %v373_v2  ;;  %721 = vmatmul.f32.vlgmr.msrb.gmra.mxu3 %v368_v4 }
  0xb6   :  { %v374_v6 = vadd.f32 %v312_v5, %v93_v54 }
  0xb8   :  { %678 = vmatmul.f32.gmra.mxu1 %v374_v6 }
  0xb9   :  { %v335_v7 = vpop.f32.mrf.mxu2 }
  0xba   :  { %v375_v8 = vadd.f32 %v335_v7, %v94_v61  ;;  %v358_v9 = vpop.f32.mrf.mxu3 }
  0xbb   :  { %v376_v10 = vadd.f32 %v358_v9, %v95_v63 }
  0xbc   :  { %701 = vmatmul.f32.gmra.mxu2 %v375_v8 }
  0xbd   :  { %724 = vmatmul.f32.gmra.mxu3 %v376_v10 }
 0x119   :  { %v561_v11 = vpop.f32.mrf.mxu0 }
 0x11a   :  { %v562_v14 = vadd.f32 %v820_v13, %v561_v11 }
 0x11c   :  { %v584_v12 = vpop.f32.mrf.mxu1 }
 0x11d   :  { %v585_v16 = vadd.f32 %v584_v12, %v562_v14 }
 0x121   :  { %v564_v15 = vpop.f32.mrf.mxu0 }
 0x122   :  { %v565_v19 = vadd.f32 %v820_v13, %v564_v15 }
 0x124   :  { %v587_v17 = vpop.f32.mrf.mxu1 }
 0x125   :  { %v588_v23 = vadd.f32 %v587_v17, %v565_v19 }
 0x126   :  { %v607_v18 = vpop.f32.mrf.mxu2 }
 0x127   :  { %v608_v20 = vadd.f32 %v607_v18, %v585_v16 }
 0x128   :  { %v630_v21 = vpop.f32.mrf.mxu3 }
 0x129   :  { %v631_v24 = vadd.f32 %v630_v21, %v608_v20 }
 0x12a   :  { %v653_v22 = vpop.f32.mrf.mxu0 }
 0x12b   :  { %v654_v27 = vadd.f32 %v653_v22, %v631_v24 }
 0x12d   :  { %v676_v26 = vpop.f32.mrf.mxu1 }
 0x12e   :  { %v610_v25 = vpop.f32.mrf.mxu2  ;;  %v677_v30 = vadd.f32 %v676_v26, %v654_v27 }
 0x12f   :  { %v611_v28 = vadd.f32 %v610_v25, %v588_v23 }
 0x130   :  { %v633_v29 = vpop.f32.mrf.mxu3 }
 0x131   :  { %v634_v31 = vadd.f32 %v633_v29, %v611_v28 }
 0x132   :  { %v656_v32 = vpop.f32.mrf.mxu0 }
 0x133   :  { %v657_v35 = vadd.f32 %v656_v32, %v634_v31 }
 0x135   :  { %v679_v37 = vpop.f32.mrf.mxu1 }
 0x136   :  { %v680_v39 = vadd.f32 %v679_v37, %v657_v35 }
 0x137   :  { %v699_v33 = vpop.f32.mrf.mxu2 }
 0x138   :  { %v700_v34 = vadd.f32 %v699_v33, %v677_v30  ;;  %v722_v36 = vpop.f32.mrf.mxu3 }
 0x13a   :  { %v723_v38 = vadd.f32 %v722_v36, %v700_v34 }
 0x13c   :  { %728 = vmax.xlane.f32.xlu0 %v723_v38 }
 0x13f   :  { %v702_v40 = vpop.f32.mrf.mxu2 }
 0x140   :  { %v703_v41 = vadd.f32 %v702_v40, %v680_v39  ;;  %v725_v42 = vpop.f32.mrf.mxu3 }
 0x142   :  { %v726_v43 = vadd.f32 %v725_v42, %v703_v41 }
 0x144   :  { %730 = vmax.xlane.f32.xlu0 %v726_v43 }
 0x1af   :  { %v729_v44 = vpop.xlane.xlu0 %728 }
 0x1b0   :  { %v732_v45 = vsub.f32 %v723_v38, %v729_v44 }
 0x1b2   :  { %v734_v46 = vmul.f32 1.442695, %v732_v45 }
 0x1b4   :  { %821 = vpow2.f32 %v734_v46 }
 0x1b7   :  { %v731_v47 = vpop.xlane.xlu0 %730 }
 0x1b8   :  { %v733_v48 = vsub.f32 %v726_v43, %v731_v47 }
 0x1ba   :  { %v822_v49 = vpop.eup %821  ;;  %v736_v50 = vmul.f32 1.442695, %v733_v48 }
 0x1bb   :  { %738 = vadd.xlane.f32.xlu1 %v822_v49 }
 0x1bc   :  { %823 = vpow2.f32 %v736_v50 }
 0x1c2   :  { %v824_v51 = vpop.eup %823 }
 0x1c3   :  { %740 = vadd.xlane.f32.xlu1 %v824_v51 }
 0x22e   :  { %v739_v52 = vpop.xlane.xlu1 %738 }
 0x22f   :  { %825 = vrcp.f32 %v739_v52  ;;  %v753_v57 = vand.u32 2147483648, %v739_v52  ;;  %v751_v59 = vand.u32 2147483647, %v739_v52  ;;  %vm747_vm2 = vweird.f32 %v739_v52 }
 0x231   :  { %v754_v62 = vor.u32 1.1754944e-38, %v753_v57  ;;  %vm752_vm4 = vcmp.eq.f32.partialorder %v751_v59, 8.507059e+37 }
 0x235   :  { %v826_v53 = vpop.eup %825 }
 0x236   :  { %v743_v54 = vmul.f32 %v826_v53, %v739_v52  ;;  %v741_v55 = vpop.xlane.xlu1 %740  ;;  %vm748_vm1 = vweird.f32 %v826_v53 }
 0x237   :  { %827 = vrcp.f32 %v741_v55  ;;  %vm749_vm3 = vmor %vm747_vm2, %vm748_vm1  ;;  %v767_v4 = vand.u32 2147483648, %v741_v55  ;;  %v765_v6 = vand.u32 2147483647, %v741_v55  ;;  %vm761_vm6 = vweird.f32 %v741_v55 }
 0x238   :  { %v744_v56 = vsub.f32 1.0, %v743_v54 }
 0x239   :  { %v768_v8 = vor.u32 1.1754944e-38, %v767_v4  ;;  %vm766_vm8 = vcmp.eq.f32.partialorder %v765_v6, 8.507059e+37 }
 0x23a   :  { %v745_v58 = vmul.f32 %v826_v53, %v744_v56 }
 0x23c   :  { %v746_v60 = vadd.f32 %v826_v53, %v745_v58 }
 0x23d   :  { %v828_v61 = vpop.eup %827 }
 0x23e   :  { %v757_v63 = vmul.f32 %v828_v61, %v741_v55  ;;  %v750_v0 = vsel %vm749_vm3, %v826_v53, %v746_v60  ;;  %vm762_vm5 = vweird.f32 %v828_v61 }
 0x23f   :  { %v755_v1 = vsel %vm752_vm4, %v754_v62, %v750_v0  ;;  %vm763_vm7 = vmor %vm761_vm6, %vm762_vm5 }
 0x240   :  { %v758_v2 = vsub.f32 1.0, %v757_v63  ;;  %v770_v3 = vmul.f32 %v822_v49, %v755_v1 }
 0x242   :  { %v759_v5 = vmul.f32 %v828_v61, %v758_v2  ;;  %772 = vst [vmem:[#allocation11] sm:$0xff] %v770_v3 }
 0x244   :  { %v760_v7 = vadd.f32 %v828_v61, %v759_v5 }
 0x246   :  { %v764_v9 = vsel %vm763_vm7, %v828_v61, %v760_v7 }
 0x247   :  { %v769_v10 = vsel %vm766_vm8, %v768_v8, %v764_v9 }
 0x248   :  { %v771_v11 = vmul.f32 %v824_v51, %v769_v10 }
 0x24a   :  { %773 = vst [vmem:[#allocation11 + $0x8] sm:$0xff] %v771_v11 }
 0x24b   :  { %786 = dma.vmem_to_hbm [thread:$0]  %s779_s15, 256, %s781_s18, [#allocation5], %s961_s30, %s961_s30, %s962_s6  }
 0x24c   :  { %955 = dma.done.wait [#allocation5], 256  }
 0x24d   :  { %956 = vsyncadd [#allocation5], 4294967040 }
 0x24e   :  { %791 = vsyncpa [#allocation4], 1 }
 0x24f   :  { %792 = vsyncpa [#allocation7], 1 }
 0x250   :  { %793 = vsyncpa [#allocation10], 1 }
 0x251   :  { %794 = vsyncpa [#allocation5], 1 }

</bundles_post_ra>
